<compile_context>
chip_gen: v5e
topology: v5e:2x2
jax: 0.10.0
libtpu: 0.0.40
codegen_flags: <defaults>
</compile_context>

<pallas_src>
import jax
import jax.numpy as jnp
from jax import lax
from jax.experimental import pallas as pl
from jax.experimental.pallas import tpu as pltpu

EPS = 1e-9
_ROW_CHUNK = 8            # sublane rows per compute slab
_COL_CHUNK = 256          # preferred lane width per compute slab (2 vregs)
_TN_CAP = 2048            # max columns per Pallas output block
_TM_CAP = 1024            # max rows per Pallas output block
_MAX_BLOCK_ELEMS = 512 * 1024   # tm*tn cap -> (2,tm,tn) f32 block <= 4 MiB


def _cdiv(a, b):
    return -(-a // b)


def _round_up(x, m):
    return ((x + m - 1) // m) * m


def _make_tps_kernel(k, tm, tn, cn, step_x, step_y):
    """Kernel factory; all shape/step constants are baked in as Python values."""
    rc = _ROW_CHUNK
    n_row_chunks = tm // rc
    n_col_chunks = tn // cn
    n_row_pairs = n_row_chunks // 2          # two 8-row slabs per iter for ILP
    row_tail = (n_row_chunks % 2) == 1

    def kernel(params_ref, o_ref):
        i = pl.program_id(0)          # row-tile index
        j = pl.program_id(1)          # col-tile index

        # ---- hoist all scalar (SMEM) reads out of the hot loops ----
        cx = [params_ref[2 * c] for c in range(k)]
        cy = [params_ref[2 * c + 1] for c in range(k)]
        wx = [params_ref[2 * k + 2 * c] for c in range(k)]
        wy = [params_ref[2 * k + 2 * c + 1] for c in range(k)]
        a0x = params_ref[4 * k + 0]
        a0y = params_ref[4 * k + 1]
        a1x = params_ref[4 * k + 2]
        a1y = params_ref[4 * k + 3]
        a2x = params_ref[4 * k + 4]
        a2y = params_ref[4 * k + 5]

        row0 = i * tm
        col0 = j * tn

        col_iota = lax.broadcasted_iota(jnp.int32, (rc, cn), 1)
        # row-only part of gy, hoisted once per kernel invocation
        gy0 = lax.broadcasted_iota(jnp.int32, (rc, cn), 0).astype(jnp.float32) * step_y

        @pl.loop(0, n_col_chunks)
        def _(cc):
            c0 = pl.multiple_of(cc * cn, 128)
            gx = (col_iota + (col0 + c0)).astype(jnp.float32) * step_x - 1.0

            # ---- column-only terms hoisted out of the row loop ----
            dx2 = []
            for cp in range(k):
                dx = gx - cx[cp]
                dx2.append(dx * dx)
            ax_gx = a0x + a1x * gx
            ay_gx = a0y + a1y * gx

            def emit_slab(r0):
                # scalar row offset on the scalar path, one vector add for gy
                gy_s = (row0 + r0).astype(jnp.float32) * step_y - 1.0
                gy = gy0 + gy_s
                acc_x = ax_gx + a2x * gy
                acc_y = ay_gx + a2y * gy
                for cp in range(k):
                    dy = gy - cy[cp]
                    d2 = dx2[cp] + dy * dy
                    # single EUP transcendental; FMAs stay on the VALU slot
                    u = d2 * jnp.log(d2 + EPS)
                    acc_x = acc_x + u * wx[cp]
                    acc_y = acc_y + u * wy[cp]
                o_ref[0, pl.ds(r0, rc), pl.ds(c0, cn)] = acc_x
                o_ref[1, pl.ds(r0, rc), pl.ds(c0, cn)] = acc_y

            if n_row_pairs > 0:
                @pl.loop(0, n_row_pairs)
                def _(pi):
                    r0 = pl.multiple_of(pi * (2 * rc), rc)
                    emit_slab(r0)                              # slab A
                    emit_slab(pl.multiple_of(r0 + rc, rc))     # slab B (ILP)

            if row_tail:
                emit_slab((n_row_chunks - 1) * rc)

    return kernel


def _choose_tiles(h, w):
    """Minimal padding, blocks <= ~4 MiB, >=2 parallel grid steps when possible."""
    h_pad = _round_up(max(h, 1), _ROW_CHUNK)
    w_pad = _round_up(max(w, 1), 128)

    # columns: big lane-dense tiles that divide a minimally padded width
    nj = _cdiv(w_pad, _TN_CAP)
    tn = _round_up(_cdiv(w_pad, nj), 128)
    w_pad = tn * nj

    # rows: keep the (double-buffered) output block a few MiB
    tm_cap = max(_ROW_CHUNK,
                 min(_TM_CAP, (_MAX_BLOCK_ELEMS // tn) // _ROW_CHUNK * _ROW_CHUNK))
    ni = _cdiv(h_pad, tm_cap)
    tm = _round_up(_cdiv(h_pad, ni), _ROW_CHUNK)
    h_pad = tm * ni

    # keep >=2 grid steps along a parallel axis for v7x megacore when possible
    if ni * nj == 1 and h_pad >= 2 * _ROW_CHUNK:
        ni = 2
        tm = _round_up(_cdiv(h_pad, ni), _ROW_CHUNK)
        h_pad = tm * ni

    cn = _COL_CHUNK if tn % _COL_CHUNK == 0 else 128
    return h_pad, w_pad, tm, tn, ni, nj, cn


def tps_forward(X, Y, w, h):
    """X, Y: (1, k, 2) float32 control points in [-1, 1]; returns (1, h, w, 2)."""
    Xs = X[0].astype(jnp.float32)   # (k, 2)
    Ys = Y[0].astype(jnp.float32)   # (k, 2)
    k = int(Xs.shape[0])

    # ---- small TPS system solve (plain JAX glue) ----
    # TODO(synk): torch.linalg.solve has no Pallas equivalent; the tiny
    # (k+3)x(k+3) system is solved with jnp.linalg.solve.
    diff = Xs[:, None, :] - Xs[None, :, :]
    D2_src = jnp.sum(diff * diff, axis=-1)
    K = D2_src * jnp.log(D2_src + EPS)
    P = jnp.concatenate([jnp.ones((k, 1), jnp.float32), Xs], axis=1)   # (k, 3)
    L = jnp.zeros((k + 3, k + 3), jnp.float32)
    L = L.at[:k, :k].set(K).at[:k, k:].set(P).at[k:, :k].set(P.T)
    Z = jnp.zeros((k + 3, 2), jnp.float32).at[:k, :].set(Ys)
    Q = jnp.linalg.solve(L, Z)
    Wm, Am = Q[:k, :], Q[k:, :]                                        # (k,2), (3,2)

    # Pack all tiny parameters into one SMEM-resident 1-D array:
    # [x0,y0,...,x_{k-1},y_{k-1}, wx0,wy0,..., a0x,a0y,a1x,a1y,a2x,a2y]
    params = jnp.concatenate(
        [Xs.reshape(-1), Wm.reshape(-1), Am.reshape(-1)]).astype(jnp.float32)

    h_pad, w_pad, tm, tn, ni, nj, cn = _choose_tiles(h, w)

    step_x = 2.0 / (w - 1) if w > 1 else 0.0   # torch.linspace(-1, 1, w)
    step_y = 2.0 / (h - 1) if h > 1 else 0.0

    kernel = _make_tps_kernel(k, tm, tn, cn, step_x, step_y)

    out = pl.pallas_call(
        kernel,
        out_shape=jax.ShapeDtypeStruct((2, h_pad, w_pad), jnp.float32),
        grid_spec=pltpu.PrefetchScalarGridSpec(
            num_scalar_prefetch=0,
            grid=(ni, nj),
            in_specs=[
                # tiny parameter table, scalar-indexed from SMEM
                pl.BlockSpec(memory_space=pltpu.MemorySpace.SMEM),
            ],
            out_specs=pl.BlockSpec((2, tm, tn), lambda i, j: (0, i, j)),
        ),
        compiler_params=pltpu.CompilerParams(
            dimension_semantics=("parallel", "parallel")),
    )(params)

    # (2, h, w) -> (1, h, w, 2)   (cheap wrapper-side layout plumbing)
    return jnp.moveaxis(out[:, :h, :w], 0, -1)[None]


def tps_reference(X, Y, w, h):
    """Pure-JAX reference mirroring the PyTorch forward exactly."""
    Xs = X[0].astype(jnp.float32)
    Ys = Y[0].astype(jnp.float32)
    k = Xs.shape[0]
    diff = Xs[:, None, :] - Xs[None, :, :]
    D2_src = jnp.sum(diff * diff, axis=-1)
    K = D2_src * jnp.log(D2_src + EPS)
    P = jnp.concatenate([jnp.ones((k, 1), jnp.float32), Xs], axis=1)
    L = jnp.zeros((k + 3, k + 3), jnp.float32)
    L = L.at[:k, :k].set(K).at[:k, k:].set(P).at[k:, :k].set(P.T)
    Z = jnp.zeros((k + 3, 2), jnp.float32).at[:k, :].set(Ys)
    Q = jnp.linalg.solve(L, Z)
    Wm, Am = Q[:k, :], Q[k:, :]

    xs = jnp.linspace(-1.0, 1.0, w)
    ys = jnp.linspace(-1.0, 1.0, h)
    gx = jnp.broadcast_to(xs[None, :], (h, w))
    gy = jnp.broadcast_to(ys[:, None], (h, w))
    grid_flat = jnp.stack([gx, gy], axis=-1).reshape(h * w, 2).astype(jnp.float32)

    D2_grid = jnp.sum((grid_flat[:, None, :] - Xs[None, :, :]) ** 2, axis=-1)
    U = D2_grid * jnp.log(D2_grid + EPS)
    P_grid = jnp.concatenate([jnp.ones((h * w, 1), jnp.float32), grid_flat], axis=1)
    warped_flat = P_grid @ Am + U @ Wm
    return warped_flat.reshape(1, h, w, 2)


if __name__ == "__main__":
    key = jax.random.PRNGKey(0)
    k_pts, h, w = 5, 16, 16
    k1, k2 = jax.random.split(key)
    X = jax.random.uniform(k1, (1, k_pts, 2), jnp.float32, minval=-1.0, maxval=1.0)
    Y = jnp.clip(X + 0.1 * jax.random.normal(k2, (1, k_pts, 2), jnp.float32), -1.0, 1.0)

    warped = jax.block_until_ready(tps_forward(X, Y, w, h))

    ref = tps_reference(X, Y, w, h)
    assert warped.shape == (1, h, w, 2)
    assert jnp.allclose(warped, ref, atol=2e-3, rtol=2e-3), "mismatch vs reference"
    print("KERNEL_OK")
</pallas_src>

<mosaic_0001>
module attributes {stable_mosaic.version = 11 : i64} {
  func.func @kernel(%arg0: i32, %arg1: i32, %arg2: memref<26xf32, #tpu.memory_space<smem>>, %arg3: memref<2x8x128xf32, #tpu.memory_space<vmem>>) attributes {dimension_semantics = [#tpu.dimension_semantics<parallel>, #tpu.dimension_semantics<parallel>], iteration_bounds = array<i64: 2, 1>, scalar_prefetch = 0 : i64, scratch_operands = 0 : i64, tpu.core_type = #tpu.core_type<tc>, window_params = [{transform_indices = @transform_0, window_bounds = array<i64: 26>}, {transform_indices = @transform_1, window_bounds = array<i64: 2, 8, 128>}]} {
    %c0 = arith.constant 0 : index
    %0 = memref.load %arg2[%c0] : memref<26xf32, #tpu.memory_space<smem>>
    %c2 = arith.constant 2 : index
    %1 = memref.load %arg2[%c2] : memref<26xf32, #tpu.memory_space<smem>>
    %c4 = arith.constant 4 : index
    %2 = memref.load %arg2[%c4] : memref<26xf32, #tpu.memory_space<smem>>
    %c6 = arith.constant 6 : index
    %3 = memref.load %arg2[%c6] : memref<26xf32, #tpu.memory_space<smem>>
    %c8 = arith.constant 8 : index
    %4 = memref.load %arg2[%c8] : memref<26xf32, #tpu.memory_space<smem>>
    %c1 = arith.constant 1 : index
    %5 = memref.load %arg2[%c1] : memref<26xf32, #tpu.memory_space<smem>>
    %c3 = arith.constant 3 : index
    %6 = memref.load %arg2[%c3] : memref<26xf32, #tpu.memory_space<smem>>
    %c5 = arith.constant 5 : index
    %7 = memref.load %arg2[%c5] : memref<26xf32, #tpu.memory_space<smem>>
    %c7 = arith.constant 7 : index
    %8 = memref.load %arg2[%c7] : memref<26xf32, #tpu.memory_space<smem>>
    %c9 = arith.constant 9 : index
    %9 = memref.load %arg2[%c9] : memref<26xf32, #tpu.memory_space<smem>>
    %c10 = arith.constant 10 : index
    %10 = memref.load %arg2[%c10] : memref<26xf32, #tpu.memory_space<smem>>
    %c12 = arith.constant 12 : index
    %11 = memref.load %arg2[%c12] : memref<26xf32, #tpu.memory_space<smem>>
    %c14 = arith.constant 14 : index
    %12 = memref.load %arg2[%c14] : memref<26xf32, #tpu.memory_space<smem>>
    %c16 = arith.constant 16 : index
    %13 = memref.load %arg2[%c16] : memref<26xf32, #tpu.memory_space<smem>>
    %c18 = arith.constant 18 : index
    %14 = memref.load %arg2[%c18] : memref<26xf32, #tpu.memory_space<smem>>
    %c11 = arith.constant 11 : index
    %15 = memref.load %arg2[%c11] : memref<26xf32, #tpu.memory_space<smem>>
    %c13 = arith.constant 13 : index
    %16 = memref.load %arg2[%c13] : memref<26xf32, #tpu.memory_space<smem>>
    %c15 = arith.constant 15 : index
    %17 = memref.load %arg2[%c15] : memref<26xf32, #tpu.memory_space<smem>>
    %c17 = arith.constant 17 : index
    %18 = memref.load %arg2[%c17] : memref<26xf32, #tpu.memory_space<smem>>
    %c19 = arith.constant 19 : index
    %19 = memref.load %arg2[%c19] : memref<26xf32, #tpu.memory_space<smem>>
    %c20 = arith.constant 20 : index
    %20 = memref.load %arg2[%c20] : memref<26xf32, #tpu.memory_space<smem>>
    %c21 = arith.constant 21 : index
    %21 = memref.load %arg2[%c21] : memref<26xf32, #tpu.memory_space<smem>>
    %c22 = arith.constant 22 : index
    %22 = memref.load %arg2[%c22] : memref<26xf32, #tpu.memory_space<smem>>
    %c23 = arith.constant 23 : index
    %23 = memref.load %arg2[%c23] : memref<26xf32, #tpu.memory_space<smem>>
    %c24 = arith.constant 24 : index
    %24 = memref.load %arg2[%c24] : memref<26xf32, #tpu.memory_space<smem>>
    %c25 = arith.constant 25 : index
    %25 = memref.load %arg2[%c25] : memref<26xf32, #tpu.memory_space<smem>>
    %c8_i32 = arith.constant 8 : i32
    %26 = arith.muli %arg0, %c8_i32 : i32
    %c128_i32 = arith.constant 128 : i32
    %27 = arith.muli %arg1, %c128_i32 : i32
    %28 = tpu.iota {dimensions = array<i32: 1>} : vector<8x128xi32>
    %29 = tpu.iota {dimensions = array<i32: 0>} : vector<8x128xi32>
    %30 = arith.sitofp %29 : vector<8x128xi32> to vector<8x128xf32>
    %cst = arith.constant 0.13333334 : f32
    %31 = vector.broadcast %cst : f32 to vector<8x128xf32>
    %32 = arith.mulf %30, %31 : vector<8x128xf32>
    %c0_i32 = arith.constant 0 : i32
    %c1_i32 = arith.constant 1 : i32
    %33 = arith.muli %c0_i32, %c1_i32 : i32
    %c0_i32_0 = arith.constant 0 : i32
    %34 = arith.addi %c0_i32_0, %33 : i32
    %c128_i32_1 = arith.constant 128 : i32
    %35 = arith.muli %34, %c128_i32_1 : i32
    %36 = tpu.assume_multiple %35, 128 : i32
    %37 = arith.addi %27, %36 : i32
    %38 = vector.broadcast %37 : i32 to vector<8x128xi32>
    %39 = arith.addi %28, %38 : vector<8x128xi32>
    %40 = arith.sitofp %39 : vector<8x128xi32> to vector<8x128xf32>
    %cst_2 = arith.constant 0.13333334 : f32
    %41 = vector.broadcast %cst_2 : f32 to vector<8x128xf32>
    %42 = arith.mulf %40, %41 : vector<8x128xf32>
    %cst_3 = arith.constant 1.000000e+00 : f32
    %43 = vector.broadcast %cst_3 : f32 to vector<8x128xf32>
    %44 = arith.subf %42, %43 : vector<8x128xf32>
    %45 = vector.broadcast %0 : f32 to vector<8x128xf32>
    %46 = arith.subf %44, %45 : vector<8x128xf32>
    %47 = arith.mulf %46, %46 : vector<8x128xf32>
    %48 = vector.broadcast %1 : f32 to vector<8x128xf32>
    %49 = arith.subf %44, %48 : vector<8x128xf32>
    %50 = arith.mulf %49, %49 : vector<8x128xf32>
    %51 = vector.broadcast %2 : f32 to vector<8x128xf32>
    %52 = arith.subf %44, %51 : vector<8x128xf32>
    %53 = arith.mulf %52, %52 : vector<8x128xf32>
    %54 = vector.broadcast %3 : f32 to vector<8x128xf32>
    %55 = arith.subf %44, %54 : vector<8x128xf32>
    %56 = arith.mulf %55, %55 : vector<8x128xf32>
    %57 = vector.broadcast %4 : f32 to vector<8x128xf32>
    %58 = arith.subf %44, %57 : vector<8x128xf32>
    %59 = arith.mulf %58, %58 : vector<8x128xf32>
    %60 = vector.broadcast %22 : f32 to vector<8x128xf32>
    %61 = arith.mulf %60, %44 : vector<8x128xf32>
    %62 = vector.broadcast %20 : f32 to vector<8x128xf32>
    %63 = arith.addf %62, %61 : vector<8x128xf32>
    %64 = vector.broadcast %23 : f32 to vector<8x128xf32>
    %65 = arith.mulf %64, %44 : vector<8x128xf32>
    %66 = vector.broadcast %21 : f32 to vector<8x128xf32>
    %67 = arith.addf %66, %65 : vector<8x128xf32>
    %c0_i32_4 = arith.constant 0 : i32
    %68 = arith.addi %26, %c0_i32_4 : i32
    %69 = arith.sitofp %68 : i32 to f32
    %cst_5 = arith.constant 0.13333334 : f32
    %70 = arith.mulf %69, %cst_5 : f32
    %cst_6 = arith.constant 1.000000e+00 : f32
    %71 = arith.subf %70, %cst_6 : f32
    %72 = vector.broadcast %71 : f32 to vector<8x128xf32>
    %73 = arith.addf %32, %72 : vector<8x128xf32>
    %74 = vector.broadcast %24 : f32 to vector<8x128xf32>
    %75 = arith.mulf %74, %73 : vector<8x128xf32>
    %76 = arith.addf %63, %75 : vector<8x128xf32>
    %77 = vector.broadcast %25 : f32 to vector<8x128xf32>
    %78 = arith.mulf %77, %73 : vector<8x128xf32>
    %79 = arith.addf %67, %78 : vector<8x128xf32>
    %80 = vector.broadcast %5 : f32 to vector<8x128xf32>
    %81 = arith.subf %73, %80 : vector<8x128xf32>
    %82 = arith.mulf %81, %81 : vector<8x128xf32>
    %83 = arith.addf %47, %82 : vector<8x128xf32>
    %cst_7 = arith.constant 9.99999971E-10 : f32
    %84 = vector.broadcast %cst_7 : f32 to vector<8x128xf32>
    %85 = arith.addf %83, %84 : vector<8x128xf32>
    %86 = math.log %85 : vector<8x128xf32>
    %87 = arith.mulf %83, %86 : vector<8x128xf32>
    %88 = vector.broadcast %10 : f32 to vector<8x128xf32>
    %89 = arith.mulf %87, %88 : vector<8x128xf32>
    %90 = arith.addf %76, %89 : vector<8x128xf32>
    %91 = vector.broadcast %15 : f32 to vector<8x128xf32>
    %92 = arith.mulf %87, %91 : vector<8x128xf32>
    %93 = arith.addf %79, %92 : vector<8x128xf32>
    %94 = vector.broadcast %6 : f32 to vector<8x128xf32>
    %95 = arith.subf %73, %94 : vector<8x128xf32>
    %96 = arith.mulf %95, %95 : vector<8x128xf32>
    %97 = arith.addf %50, %96 : vector<8x128xf32>
    %cst_8 = arith.constant 9.99999971E-10 : f32
    %98 = vector.broadcast %cst_8 : f32 to vector<8x128xf32>
    %99 = arith.addf %97, %98 : vector<8x128xf32>
    %100 = math.log %99 : vector<8x128xf32>
    %101 = arith.mulf %97, %100 : vector<8x128xf32>
    %102 = vector.broadcast %11 : f32 to vector<8x128xf32>
    %103 = arith.mulf %101, %102 : vector<8x128xf32>
    %104 = arith.addf %90, %103 : vector<8x128xf32>
    %105 = vector.broadcast %16 : f32 to vector<8x128xf32>
    %106 = arith.mulf %101, %105 : vector<8x128xf32>
    %107 = arith.addf %93, %106 : vector<8x128xf32>
    %108 = vector.broadcast %7 : f32 to vector<8x128xf32>
    %109 = arith.subf %73, %108 : vector<8x128xf32>
    %110 = arith.mulf %109, %109 : vector<8x128xf32>
    %111 = arith.addf %53, %110 : vector<8x128xf32>
    %cst_9 = arith.constant 9.99999971E-10 : f32
    %112 = vector.broadcast %cst_9 : f32 to vector<8x128xf32>
    %113 = arith.addf %111, %112 : vector<8x128xf32>
    %114 = math.log %113 : vector<8x128xf32>
    %115 = arith.mulf %111, %114 : vector<8x128xf32>
    %116 = vector.broadcast %12 : f32 to vector<8x128xf32>
    %117 = arith.mulf %115, %116 : vector<8x128xf32>
    %118 = arith.addf %104, %117 : vector<8x128xf32>
    %119 = vector.broadcast %17 : f32 to vector<8x128xf32>
    %120 = arith.mulf %115, %119 : vector<8x128xf32>
    %121 = arith.addf %107, %120 : vector<8x128xf32>
    %122 = vector.broadcast %8 : f32 to vector<8x128xf32>
    %123 = arith.subf %73, %122 : vector<8x128xf32>
    %124 = arith.mulf %123, %123 : vector<8x128xf32>
    %125 = arith.addf %56, %124 : vector<8x128xf32>
    %cst_10 = arith.constant 9.99999971E-10 : f32
    %126 = vector.broadcast %cst_10 : f32 to vector<8x128xf32>
    %127 = arith.addf %125, %126 : vector<8x128xf32>
    %128 = math.log %127 : vector<8x128xf32>
    %129 = arith.mulf %125, %128 : vector<8x128xf32>
    %130 = vector.broadcast %13 : f32 to vector<8x128xf32>
    %131 = arith.mulf %129, %130 : vector<8x128xf32>
    %132 = arith.addf %118, %131 : vector<8x128xf32>
    %133 = vector.broadcast %18 : f32 to vector<8x128xf32>
    %134 = arith.mulf %129, %133 : vector<8x128xf32>
    %135 = arith.addf %121, %134 : vector<8x128xf32>
    %136 = vector.broadcast %9 : f32 to vector<8x128xf32>
    %137 = arith.subf %73, %136 : vector<8x128xf32>
    %138 = arith.mulf %137, %137 : vector<8x128xf32>
    %139 = arith.addf %59, %138 : vector<8x128xf32>
    %cst_11 = arith.constant 9.99999971E-10 : f32
    %140 = vector.broadcast %cst_11 : f32 to vector<8x128xf32>
    %141 = arith.addf %139, %140 : vector<8x128xf32>
    %142 = math.log %141 : vector<8x128xf32>
    %143 = arith.mulf %139, %142 : vector<8x128xf32>
    %144 = vector.broadcast %14 : f32 to vector<8x128xf32>
    %145 = arith.mulf %143, %144 : vector<8x128xf32>
    %146 = arith.addf %132, %145 : vector<8x128xf32>
    %147 = vector.broadcast %19 : f32 to vector<8x128xf32>
    %148 = arith.mulf %143, %147 : vector<8x128xf32>
    %149 = arith.addf %135, %148 : vector<8x128xf32>
    %c0_12 = arith.constant 0 : index
    %c0_13 = arith.constant 0 : index
    %150 = arith.index_cast %36 : i32 to index
    %151 = vector.load %arg3[%c0_12, %c0_13, %150] : memref<2x8x128xf32, #tpu.memory_space<vmem>>, vector<1x8x128xf32>
    %152 = vector.shape_cast %151 : vector<1x8x128xf32> to vector<8x128xf32>
    %153 = vector.shape_cast %146 : vector<8x128xf32> to vector<1x8x128xf32>
    tpu.vector_store %arg3[%c0_12, %c0_13, %150], %153 {strides = array<i32>} : memref<2x8x128xf32, #tpu.memory_space<vmem>>, vector<1x8x128xf32>,
    %c1_14 = arith.constant 1 : index
    %c0_15 = arith.constant 0 : index
    %154 = arith.index_cast %36 : i32 to index
    %155 = vector.load %arg3[%c1_14, %c0_15, %154] : memref<2x8x128xf32, #tpu.memory_space<vmem>>, vector<1x8x128xf32>
    %156 = vector.shape_cast %155 : vector<1x8x128xf32> to vector<8x128xf32>
    %157 = vector.shape_cast %149 : vector<8x128xf32> to vector<1x8x128xf32>
    tpu.vector_store %arg3[%c1_14, %c0_15, %154], %157 {strides = array<i32>} : memref<2x8x128xf32, #tpu.memory_space<vmem>>, vector<1x8x128xf32>,
    %c1_i32_16 = arith.constant 1 : i32
    return
  }
  func.func @transform_0(%arg0: i32, %arg1: i32) -> i32 {
    %c0_i32 = arith.constant 0 : i32
    %c0_i32_0 = arith.constant 0 : i32
    return %c0_i32 : i32
  }
  func.func @transform_1(%arg0: i32, %arg1: i32) -> (i32, i32, i32) {
    %c0_i32 = arith.constant 0 : i32
    %c0_i32_0 = arith.constant 0 : i32
    return %c0_i32, %arg0, %arg1 : i32, i32, i32
  }
}

</mosaic_0001>

<bundles_post_ra>
// kernel: tpu_custom_call.1
= control target key start
LH: loop header
LB: loop body
LE: loop exit
PB: predicated region body
PF: predicated region fallthrough
CT: control target
= control target key end

     0   :  { %6 = vsyncpa [#allocation4], 0  ;;  %s767_s0 = inlined_call_operand.hbm [shape: f32[26], index: 0, kind: input, shape index: {}]   ;;  %s768_s1 = inlined_call_operand.hbm [shape: f32[2,16,128], index: 1, kind: output, shape index: {}]  }
   0x1   :  { %7 = vsyncpa [#allocation3], 0 }
   0x2   :  { %9 = vsyncpa [#allocation3 + $0x1], 0  ;;  %s591_s6 = smov 0   ;;  %s593_s7 = smov 0  }
   0x3   :  { %s595_s8 = smov 0   ;;  %s597_s9 = smov 0  }
   0x4   :  { %s599_s10 = smov 0   ;;  %s601_s11 = smov 0  }
   0x5 LB: > { %s359_s12 = sadd.s32 4294967295, %s575_s11   ;;  %s360_s13 = sadd.s32 4294967294, %s575_s11   ;;  %s575_s11 = sphi %s601_s11, %s15_s11   ;;  %s571_s10 = sphi %s599_s10, %s775_s10   ;;  %s567_s9 = sphi %s597_s9, %s774_s9   ;;  %s563_s8 = sphi %s595_s8, %s773_s8   ;;  %s559_s7 = sphi %s593_s7, %s772_s7   ;;  %s555_s6 = sphi %s591_s6, %s771_s6  }
   0x6   : > { %s27_s14 = sadd.s32 1, %s571_s10  ;;  %s57_s15 = sadd.s32 1, %s563_s8 }
   0x7   : > { %p29_p0 = scmp.ge.s32.totalorder %s27_s14, 2  ;;  %p67_p1 = scmp.ne.s32.totalorder %s563_s8, %s559_s7 }
   0x8   : > { %p68_p2 = scmp.eq.s32.totalorder %s359_s12, 1  ;;  %p73_p3 = scmp.ne.s32.totalorder %s559_s7, %s555_s6 }
   0x9   : > { %s777_s14 = smov (%p29_p0, %s27_s14), 0  ;;  %p74_p5 = scmp.eq.s32.totalorder %s360_s13, 1 }
   0xa   : > { %p631_p4 = por %p68_p2, %p67_p1  ;;  %s52_s17 = ssub.s32 %s571_s10, %s777_s14 }
   0xb   : > { %p361_p6 = scmp.ge.s32.totalorder %s575_s11, 1  ;;  %p55_p7 = scmp.eq.s32.totalorder %s52_s17, 0 }
   0xc   : > { %p638_p8 = por %p74_p5, %p73_p3  ;;  %p81_p9 = scmp.lt.s32.totalorder %s575_s11, 3 }
   0xd   : > { %s644_s19 = scalar_select %p55_p7, %s563_s8, %s57_s15  }
   0xe   : > { %p82_p10 = pnand %p361_p6, %p81_p9  ;;  %p413_p11 = scmp.eq.s32.totalorder %s359_s12, 0 }
   0xf   : > { %s93_s22 = sshll.u32 %s767_s0, 4  ;;  %s577_s23 = smov [#allocation2]   ;;  %s94_s22 = int_to_ptr.hbm [resolvable:$true] %s93_s22 }
  0x10   : > { %p405_p12 = pneg %p82_p10  ;;  %106 = sbr.rel (%p82_p10) target bundleno = 76 (0x4c), region = 24 }
  0x12   : > { %p406_p13 = pnand %p413_p11, %p405_p12 }
  0x14   : > { %408 = dma.hbm_to_smem (!%p406_p13), %s94_s22, 16, %s577_s23, [#allocation4]  }
  0x15   : > { %546 = dma.done.wait (%p413_p11), [#allocation4], 16  }
  0x16   : > { %548 = vsyncadd (%p413_p11), [#allocation4], 4294967280 }
  0x17   : > { %113 = sfence }
  0x18   : > { %v151_v0 = vlaneseq  ;;  %s123_s24 = sld [smem:[#allocation2]]  ;;  %s391_s28 = sshll.u32 %s567_s9, 3 }
  0x19   : > { %s366_s25 = sld [smem:[#allocation2 + $0x2]]  ;;  %s186_s3 = scvt.s32.f32 %s391_s28 }
  0x1a   : > { %v152_v1 = vand.u32 127, %v151_v0  ;;  %s367_s26 = sld [smem:[#allocation2 + $0x4]]  ;;  %v154_v3 = vshrl.u32 %v151_v0, 7 }
  0x1b   : > { %s368_s27 = sld [smem:[#allocation2 + $0x6]]  ;;  %s187_s13 = smul.f32 0.13333334, %s186_s3 }
  0x1c   : > { %v160_v2 = vcvt.s32.f32 %v152_v1  ;;  %s369_s29 = sld [smem:[#allocation2 + $0x8]]  ;;  %v155_v5 = vcvt.s32.f32 %v154_v3 }
  0x1d   : > { %s650_s30 = sld [smem:[#allocation2 + $0x1]] }
  0x1e   : > { %s652_s2 = sld [smem:[#allocation2 + $0x3]]  ;;  %v161_v4 = vmul.f32 0.13333334, %v160_v2  ;;  %v163_v7 = vstv %s123_s24  ;;  %v156_v11 = vmul.f32 0.13333334, %v155_v5 }
  0x1f   : > { %s656_s4 = sld [smem:[#allocation2 + $0x5]]  ;;  %v166_v8 = vstv %s366_s25 }
  0x20   : > { %s658_s5 = sld [smem:[#allocation2 + $0x7]]  ;;  %v662_v6 = vadd.f32 -1.0, %v161_v4  ;;  %v169_v9 = vstv %s367_s26 }
  0x21   : > { %s660_s12 = sld [smem:[#allocation2 + $0x9]]  ;;  %v172_v10 = vstv %s368_s27 }
  0x22   : > { %v175_v12 = vstv %s369_s29  ;;  %v164_v13 = vsub.f32 %v662_v6, %v163_v7  ;;  %v167_v14 = vsub.f32 %v662_v6, %v166_v8  ;;  %s393_s15 = sadd.f32 -1.0, %s187_s13  ;;  %v170_v15 = vsub.f32 %v662_v6, %v169_v9  ;;  %s120_s13 = sand.u32 1, %s559_s7  }
  0x23   : > { %v173_v16 = vsub.f32 %v662_v6, %v172_v10  ;;  %v176_v17 = vsub.f32 %v662_v6, %v175_v12  ;;  %v197_v19 = vstv %s650_s30  ;;  %s671_s17 = sld [smem:[#allocation2 + $0x16]]  ;;  %s272_s9 = scalar_lea.sflag [#allocation3], %s120_s13 }
  0x24   : > { %v189_v18 = vstv %s393_s15  ;;  %v211_v20 = vstv %s652_s2  ;;  %s676_s20 = sld [smem:[#allocation2 + $0x14]]  ;;  %v165_v25 = vmul.f32 %v164_v13, %v164_v13  ;;  %v168_v26 = vmul.f32 %v167_v14, %v167_v14  ;;  %s365_s15 = sshll.u32 %s120_s13, 4 }
  0x25   : > { %v190_v21 = vadd.f32 %v189_v18, %v156_v11  ;;  %v225_v22 = vstv %s656_s4  ;;  %s678_s21 = sld [smem:[#allocation2 + $0x18]]  ;;  %v171_v27 = vmul.f32 %v170_v15, %v170_v15  ;;  %v174_v28 = vmul.f32 %v173_v16, %v173_v16 }
  0x26   : > { %v239_v23 = vstv %s658_s5  ;;  %v177_v31 = vmul.f32 %v176_v17, %v176_v17  ;;  %s680_s22 = sld [smem:[#allocation2 + $0x15]] }
  0x27   : > { %v253_v24 = vstv %s660_s12  ;;  %v198_v29 = vsub.f32 %v190_v21, %v197_v19  ;;  %v212_v30 = vsub.f32 %v190_v21, %v211_v20  ;;  %v226_v32 = vsub.f32 %v190_v21, %v225_v22  ;;  %s388_s23 = sld [smem:[#allocation2 + $0x17]] }
  0x28   : > { %v240_v33 = vsub.f32 %v190_v21, %v239_v23  ;;  %v254_v34 = vsub.f32 %v190_v21, %v253_v24  ;;  %s682_s24 = sld [smem:[#allocation2 + $0x19]] }
  0x29   : > { %v199_v35 = vmul.f32 %v198_v29, %v198_v29  ;;  %v213_v36 = vmul.f32 %v212_v30, %v212_v30  ;;  %v227_v37 = vmul.f32 %v226_v32, %v226_v32  ;;  %s684_s25 = sld [smem:[#allocation2 + $0xa]]  ;;  %v178_v45 = vstv %s671_s17 }
  0x2a   : > { %v241_v38 = vmul.f32 %v240_v33, %v240_v33  ;;  %v255_v39 = vmul.f32 %v254_v34, %v254_v34  ;;  %s686_s26 = sld [smem:[#allocation2 + $0xc]]  ;;  %v179_v52 = vmul.f32 %v662_v6, %v178_v45  ;;  %v180_v53 = vstv %s676_s20 }
  0x2b   : > { %v200_v40 = vadd.f32 %v199_v35, %v165_v25  ;;  %v214_v41 = vadd.f32 %v213_v36, %v168_v26  ;;  %v228_v42 = vadd.f32 %v227_v37, %v171_v27  ;;  %s690_s27 = sld [smem:[#allocation2 + $0xe]]  ;;  %v191_v55 = vstv %s678_s21  ;;  %s283_s21 = scalar_lea.hbm %s768_s1, %s391_s28 }
  0x2c   : > { %v242_v43 = vadd.f32 %v241_v38, %v174_v28  ;;  %v688_v44 = vadd.f32 %v255_v39, %v177_v31  ;;  %s693_s29 = sld [smem:[#allocation2 + $0xb]]  ;;  %v184_v56 = vstv %s680_s22  ;;  %v181_v58 = vadd.f32 %v180_v53, %v179_v52  ;;  %s122_s22 = scalar_lea.vmem [#allocation5], %s365_s15 }
  0x2d   : > { %v201_v46 = vadd.f32 1e-09, %v200_v40  ;;  %v215_v47 = vadd.f32 1e-09, %v214_v41  ;;  %v229_v48 = vadd.f32 1e-09, %v228_v42  ;;  %v182_v51 = vstv %s388_s23 }
  0x2e   : > { %v243_v49 = vadd.f32 1e-09, %v242_v43  ;;  %v257_v50 = vadd.f32 1e-09, %v688_v44  ;;  %s696_s30 = sld [smem:[#allocation2 + $0xd]]  ;;  %v183_v54 = vmul.f32 %v662_v6, %v182_v51  ;;  %v194_v57 = vstv %s682_s24  ;;  %s284_s23 = sshll.u32 %s122_s22, 4  ;;  %s285_s23 = int_to_ptr.vmem [resolvable:$true] %s284_s23 }
  0x2f   : > { %468 = vlog2.f32 %v201_v46  ;;  %s698_s2 = sld [smem:[#allocation2 + $0x10]]  ;;  %v192_v59 = vmul.f32 %v191_v55, %v190_v21  ;;  %v195_v61 = vmul.f32 %v194_v57, %v190_v21  ;;  %v205_v1 = vstv %s684_s25  ;;  %s286_s24 = sshll.u32 %s283_s21, 4  ;;  %s287_s24 = int_to_ptr.hbm [resolvable:$true] %s286_s24 }
  0x30   : > { %470 = vlog2.f32 %v215_v47  ;;  %s704_s3 = sld [smem:[#allocation2 + $0xf]]  ;;  %v185_v60 = vadd.f32 %v184_v56, %v183_v54  ;;  %v219_v2 = vstv %s686_s26  ;;  %s507_s28 = sshra.s32 %s287_s24, 4  ;;  %s508_s28 = int_to_ptr.hbm [resolvable:$true] %s507_s28 }
  0x31   : > { %472 = vlog2.f32 %v229_v48  ;;  %s708_s4 = sld [smem:[#allocation2 + $0x11]]  ;;  %v233_v5 = vstv %s690_s27  ;;  %v193_v9 = vadd.f32 %v192_v59, %v181_v58  ;;  %s509_s25 = scalar_lea.hbm %s508_s28, 16 }
  0x32   : > { %474 = vlog2.f32 %v243_v49  ;;  %s710_s5 = sld [smem:[#allocation2 + $0x12]]  ;;  %v208_v6 = vstv %s693_s29  ;;  %v196_v12 = vadd.f32 %v195_v61, %v185_v60  ;;  %p510_p0 = scmp.ne.s32.totalorder %s508_s28, %s509_s25 }
  0x33   : > { %476 = vlog2.f32 %v257_v50  ;;  %s712_s12 = sld [smem:[#allocation2 + $0x13]]  ;;  %s513_s29 = scalar_lea.hbm %s768_s1, 32 }
  0x34   : > { %v222_v7 = vstv %s696_s30  ;;  %p511_p1 = pnand %p510_p0, %p631_p4  ;;  %p514_p3 = scmp.lt.s32.totalorder %s508_s28, %s768_s1 }
  0x35   : > { %v469_v62 = vpop.eup %468  ;;  %v247_v16 = vstv %s698_s2  ;;  %p515_p5 = scmp.lt.s32.totalorder %s513_s29, %s509_s25 }
  0x36   : > { %v471_v63 = vpop.eup %470  ;;  %v203_v0 = vmul.f32 0.6931472, %v469_v62  ;;  %v236_v17 = vstv %s704_s3  ;;  %p512_p2 = pneg %p511_p1 }
  0x37   : > { %v473_v3 = vpop.eup %472  ;;  %v217_v4 = vmul.f32 0.6931472, %v471_v63  ;;  %v250_v25 = vstv %s708_s4  ;;  %p516_p6 = por %p515_p5, %p514_p3 }
  0x38   : > { %v475_v8 = vpop.eup %474  ;;  %v204_v10 = vmul.f32 %v203_v0, %v200_v40  ;;  %v231_v11 = vmul.f32 0.6931472, %v473_v3  ;;  %v261_v30 = vstv %s710_s5 }
  0x39   : > { %v477_v13 = vpop.eup %476  ;;  %v218_v14 = vmul.f32 %v217_v4, %v214_v41  ;;  %v245_v15 = vmul.f32 0.6931472, %v475_v8  ;;  %v264_v32 = vstv %s712_s12  ;;  %p517_p7 = pnand %p516_p6, %p512_p2 }
  0x3a   : > { %v206_v18 = vmul.f32 %v205_v1, %v204_v10  ;;  %v232_v19 = vmul.f32 %v231_v11, %v228_v42  ;;  %v259_v20 = vmul.f32 0.6931472, %v477_v13  ;;  %v209_v21 = vmul.f32 %v208_v6, %v204_v10 }
  0x3b   : > { %v220_v22 = vmul.f32 %v219_v2, %v218_v14  ;;  %v246_v23 = vmul.f32 %v245_v15, %v242_v43  ;;  %v223_v24 = vmul.f32 %v222_v7, %v218_v14 }
  0x3c   : > { %v207_v26 = vadd.f32 %v206_v18, %v193_v9  ;;  %v234_v27 = vmul.f32 %v233_v5, %v232_v19  ;;  %v260_v28 = vmul.f32 %v259_v20, %v688_v44  ;;  %v210_v29 = vadd.f32 %v209_v21, %v196_v12 }
  0x3d   : > { %v237_v31 = vmul.f32 %v236_v17, %v232_v19  ;;  %v248_v34 = vmul.f32 %v247_v16, %v246_v23  ;;  %v251_v36 = vmul.f32 %v250_v25, %v246_v23 }
  0x3e   : > { %v221_v33 = vadd.f32 %v220_v22, %v207_v26  ;;  %v224_v35 = vadd.f32 %v223_v24, %v210_v29  ;;  %v262_v38 = vmul.f32 %v261_v30, %v260_v28  ;;  %v265_v40 = vmul.f32 %v264_v32, %v260_v28 }
  0x40   : > { %v235_v37 = vadd.f32 %v234_v27, %v221_v33  ;;  %v238_v39 = vadd.f32 %v237_v31, %v224_v35 }
  0x42   : > { %v249_v41 = vadd.f32 %v248_v34, %v235_v37  ;;  %v252_v42 = vadd.f32 %v251_v36, %v238_v39 }
  0x44   : > { %v263_v43 = vadd.f32 %v262_v38, %v249_v41  ;;  %v266_v44 = vadd.f32 %v265_v40, %v252_v42 }
  0x46   : > { %267 = vst [vmem:[%s122_s22] sm:$0xff] %v263_v43 }
  0x47   : > { %394 = vst [vmem:[%s122_s22 + $0x8] sm:$0xff] %v266_v44 }
  0x48   : > { %520 = shalt.err (!%p517_p7)
}
  0x49   : > { %s578_s3 = smov 128   ;;  %s579_s4 = smov 256  }
  0x4a   : > { %s580_s5 = smov 8  }
  0x4b   : > { %403 = dma.vmem_to_hbm [thread:$0]  (%p631_p4), %s285_s23, 256, %s287_s24, %s272_s9, %s578_s3, %s579_s4, %s580_s5  }
  0x4c PF: > { %p415_p9 = scmp.ge.s32.totalorder %s575_s11, 2  ;;  %s301_s12 = sand.u32 1, %s555_s6  }
  0x4d   : > { %s302_s13 = scalar_lea.sflag [#allocation3], %s301_s12 }
  0x4e   : > { %p410_p10 = pnand %p415_p9, %p638_p8 }
  0x50   : > { %p411_p11 = pneg %p410_p10 }
  0x52   : > { %550 = dma.done.wait (%p411_p11), %s302_s13, 256  }
  0x53   : > { %552 = vsyncadd (%p411_p11), %s302_s13, 4294967040  ;;  %s15_s11 = sadd.s32 1, %s575_s11   ;;  %s771_s6 = smov %s559_s7 }
  0x54   : > { %p12_p12 = scmp.ge.s32.totalorder %s15_s11, 4   ;;  %s772_s7 = smov %s563_s8 }
  0x55   : > { %s773_s8 = smov %s644_s19  ;;  %s774_s9 = smov %s571_s10 }
  0x56   : > { %s775_s10 = smov %s777_s14  ;;  %14 = sbr.rel (!%p12_p12) target bundleno = 5 (0x5), region = 62 }
  0x5b   :  { %308 = vsyncpa [#allocation3], 1 }
  0x5c   :  { %310 = vsyncpa [#allocation3 + $0x1], 1 }
  0x5d   :  { %311 = vsyncpa [#allocation4], 1 }
  0x5e   :  { %313 = vsyncpa [#allocation4 + $0x1], 1 }

</bundles_post_ra>
